<compile_context>
chip_gen: v7x
topology: tpu7x:2x2x1
jax: 0.10.0
libtpu: 0.0.40
codegen_flags: <defaults>
</compile_context>

<pallas_src>
import functools

import jax
import jax.numpy as jnp
from jax.experimental import pallas as pl
from jax.experimental.pallas import tpu as pltpu

MISSING_TYPE_INDEX = {"language": 1, "video": 2, "audio": 3}
MODALITY_TYPES = ("language", "video", "audio")
LN_EPS = 1e-5
DEFAULT_BLOCK_ROWS = 2048     # row tile (multiple of 8); amortizes per-step overhead,
                              # stays well under v5e's 16 MiB default scoped VMEM.


def _fused_kernel(xl_ref, xv_ref, xa_ref, miss_ref,
                  wp_ref, bp_ref, gamma_ref, beta_ref,
                  w1_ref, b1_ref, w2_ref, b2_ref, out_ref,
                  *, modal_ids):
    """One batch tile: mask -> block-diag projection -> LayerNorm -> Linear/ReLU/Linear."""
    miss = miss_ref[...]                                   # [TB, 1] int32
    chunks = []
    for ref, mid in zip((xl_ref, xv_ref, xa_ref), modal_ids):
        keep = miss != mid                                 # [TB, 1] bool
        chunks.append(jnp.where(keep, ref[...], 0.0).astype(jnp.bfloat16))
    xm = jnp.concatenate(chunks, axis=-1)                  # [TB, M*F] bf16 (in VMEM)

    # All three modality projections as ONE MXU matmul (block-diagonal weights);
    # result is already the lane-contiguous concatenated h.
    h = jnp.dot(xm, wp_ref[...], preferred_element_type=jnp.float32) + bp_ref[...]

    # LayerNorm over the fused feature axis (f32, biased variance like nn.LayerNorm).
    mean = jnp.mean(h, axis=-1, keepdims=True)
    var = jnp.mean(jnp.square(h - mean), axis=-1, keepdims=True)
    hn = (h - mean) * jax.lax.rsqrt(var + LN_EPS)
    hn = hn * gamma_ref[...] + beta_ref[...]

    # Head: Linear -> ReLU -> Dropout(identity at inference) -> Linear.
    z = jnp.dot(hn.astype(jnp.bfloat16), w1_ref[...],
                preferred_element_type=jnp.float32) + b1_ref[...]
    z = jnp.maximum(z, 0.0)
    out = jnp.dot(z.astype(jnp.bfloat16), w2_ref[...],
                  preferred_element_type=jnp.float32) + b2_ref[...]
    out_ref[...] = out.astype(out_ref.dtype)               # [TB, O] store (O == full dim)


def _row_tile(B, block_rows):
    """Multiple-of-8 row tile; rebalanced so large batches give >=2 near-equal blocks."""
    if B <= block_rows:
        return ((max(B, 1) + 7) // 8) * 8
    n_blocks = pl.cdiv(B, block_rows)
    return ((pl.cdiv(B, n_blocks) + 7) // 8) * 8


@functools.partial(jax.jit, static_argnames=("block_rows",))
def modal_concat_zero_padding_forward(batch, missing_index, params,
                                      block_rows=DEFAULT_BLOCK_ROWS):
    """batch: dict modality -> [B, feature_dims]; missing_index: [B] int."""
    num_modal = len(MODALITY_TYPES)
    xs = [batch[m] for m in MODALITY_TYPES]                # passed through untouched
    B, F = xs[0].shape
    fusion = params["wp"].shape[-1]
    MF = num_modal * F
    MD = num_modal * fusion
    O = params["w2"].shape[-1]

    tb = _row_tile(B, block_rows)
    grid = (pl.cdiv(B, tb),)                               # edge block masked by Pallas

    miss = missing_index.astype(jnp.int32).reshape(B, 1)

    # Block-diagonal projection weight: 3 skinny matmuls + lane concat -> 1 MXU matmul.
    wp_bd = jax.scipy.linalg.block_diag(
        *[params["wp"][i] for i in range(num_modal)]).astype(jnp.bfloat16)   # [M*F, M*fusion]
    bp_cat = jnp.concatenate([params["bp"][i] for i in range(num_modal)],
                             axis=-1).astype(jnp.float32)                    # [1, M*fusion]

    gamma = params["gamma"].astype(jnp.float32)
    beta = params["beta"].astype(jnp.float32)
    w1 = params["w1"].astype(jnp.bfloat16)
    b1 = params["b1"].astype(jnp.float32)
    w2 = params["w2"].astype(jnp.bfloat16)                 # no lane padding of O
    b2 = params["b2"].astype(jnp.float32)

    modal_ids = tuple(MISSING_TYPE_INDEX[m] for m in MODALITY_TYPES)
    kernel = functools.partial(_fused_kernel, modal_ids=modal_ids)

    def row_spec(f):
        return pl.BlockSpec((tb, f), lambda i: (i, 0))     # pipelined batch tiles

    def const(shape):
        return pl.BlockSpec(shape, lambda i: (0, 0))       # VMEM-resident weights

    out = pl.pallas_call(
        kernel,
        out_shape=jax.ShapeDtypeStruct((B, O), jnp.float32),
        grid=grid,
        in_specs=[
            row_spec(F), row_spec(F), row_spec(F),         # x_language, x_video, x_audio
            row_spec(1),                                   # missing_index
            const((MF, MD)),                               # block-diagonal W_proj (bf16)
            const((1, MD)),                                # b_proj
            const((1, MD)),                                # gamma
            const((1, MD)),                                # beta
            const((MD, fusion)),                           # W1 (bf16)
            const((1, fusion)),                            # b1
            const((fusion, O)),                            # W2 (bf16)
            const((1, O)),                                 # b2
        ],
        out_specs=pl.BlockSpec((tb, O), lambda i: (i, 0)),
        compiler_params=pltpu.CompilerParams(
            dimension_semantics=("parallel",)),
    )(xs[0], xs[1], xs[2], miss,
      wp_bd, bp_cat, gamma, beta, w1, b1, w2, b2)

    return out


def _reference_forward(batch, missing_index, params):
    """Plain-JAX f32 reference for correctness checking."""
    parts = []
    for i, m in enumerate(MODALITY_TYPES):
        xm = batch[m].astype(jnp.float32)
        keep = (missing_index != MISSING_TYPE_INDEX[m]).astype(xm.dtype)[:, None]
        xm = xm * keep
        parts.append(xm @ params["wp"][i] + params["bp"][i])
    h = jnp.concatenate(parts, axis=-1)
    mean = jnp.mean(h, axis=-1, keepdims=True)
    var = jnp.mean(jnp.square(h - mean), axis=-1, keepdims=True)
    hn = (h - mean) * jax.lax.rsqrt(var + LN_EPS)
    hn = hn * params["gamma"] + params["beta"]
    z = jnp.maximum(hn @ params["w1"] + params["b1"], 0.0)
    return z @ params["w2"] + params["b2"]


def _init_params(key, feature_dims, fusion_dim, output_dims):
    num_modal = len(MODALITY_TYPES)
    D = fusion_dim * num_modal
    k = jax.random.split(key, 6)
    scale = 0.05
    return {
        # per-modality projection weights stored as [in, out] (transposed vs torch)
        "wp": scale * jax.random.normal(k[0], (num_modal, feature_dims, fusion_dim), jnp.float32),
        "bp": scale * jax.random.normal(k[1], (num_modal, 1, fusion_dim), jnp.float32),
        "gamma": jnp.ones((1, D), jnp.float32),
        "beta": jnp.zeros((1, D), jnp.float32),
        "w1": scale * jax.random.normal(k[2], (D, fusion_dim), jnp.float32),
        "b1": scale * jax.random.normal(k[3], (1, fusion_dim), jnp.float32),
        "w2": scale * jax.random.normal(k[4], (fusion_dim, output_dims), jnp.float32),
        "b2": scale * jax.random.normal(k[5], (1, output_dims), jnp.float32),
    }


if __name__ == "__main__":
    # small, module-consistent shapes
    B, feature_dims, fusion_dim, output_dims = 8, 32, 32, 4

    key = jax.random.PRNGKey(0)
    kp, kx = jax.random.split(key)
    params = _init_params(kp, feature_dims, fusion_dim, output_dims)

    kxs = jax.random.split(kx, len(MODALITY_TYPES))
    batch = {
        m: jax.random.normal(kxs[i], (B, feature_dims), jnp.float32)
        for i, m in enumerate(MODALITY_TYPES)
    }
    # missing_index: 0 = complete, 1/2/3 = that modality is missing
    missing_index = jnp.array([0, 1, 2, 3, 0, 1, 2, 3], dtype=jnp.int32)

    out = modal_concat_zero_padding_forward(batch, missing_index, params)
    out = jax.block_until_ready(out)

    ref = _reference_forward(batch, missing_index, params)
    assert out.shape == (B, output_dims)
    # bf16 MXU operands with f32 accumulation -> slightly relaxed tolerance vs f32 reference
    assert jnp.allclose(out, ref, atol=2e-2, rtol=2e-2), "mismatch vs reference"

    # TODO(synk): Dropout is treated as identity (inference-mode semantics).
    print("KERNEL_OK")
</pallas_src>

<mosaic_0001>
module attributes {stable_mosaic.version = 11 : i64} {
  func.func @_fused_kernel(%arg0: i32, %arg1: memref<8x32xf32, #tpu.memory_space<vmem>>, %arg2: memref<8x32xf32, #tpu.memory_space<vmem>>, %arg3: memref<8x32xf32, #tpu.memory_space<vmem>>, %arg4: memref<8x1xi32, #tpu.memory_space<vmem>>, %arg5: memref<96x96xbf16, #tpu.memory_space<vmem>>, %arg6: memref<1x96xf32, #tpu.memory_space<vmem>>, %arg7: memref<1x96xf32, #tpu.memory_space<vmem>>, %arg8: memref<1x96xf32, #tpu.memory_space<vmem>>, %arg9: memref<96x32xbf16, #tpu.memory_space<vmem>>, %arg10: memref<1x32xf32, #tpu.memory_space<vmem>>, %arg11: memref<32x4xbf16, #tpu.memory_space<vmem>>, %arg12: memref<1x4xf32, #tpu.memory_space<vmem>>, %arg13: memref<8x4xf32, #tpu.memory_space<vmem>>) attributes {dimension_semantics = [#tpu.dimension_semantics<parallel>], iteration_bounds = array<i64: 1>, scalar_prefetch = 0 : i64, scratch_operands = 0 : i64, tpu.core_type = #tpu.core_type<tc>, window_params = [{transform_indices = @transform_0, window_bounds = array<i64: 8, 32>}, {transform_indices = @transform_1, window_bounds = array<i64: 8, 32>}, {transform_indices = @transform_2, window_bounds = array<i64: 8, 32>}, {transform_indices = @transform_3, window_bounds = array<i64: 8, 1>}, {pipeline_mode = #tpu.pipeline_mode<synchronous>, transform_indices = @transform_4, window_bounds = array<i64: 96, 96>}, {pipeline_mode = #tpu.pipeline_mode<synchronous>, transform_indices = @transform_5, window_bounds = array<i64: 1, 96>}, {pipeline_mode = #tpu.pipeline_mode<synchronous>, transform_indices = @transform_6, window_bounds = array<i64: 1, 96>}, {pipeline_mode = #tpu.pipeline_mode<synchronous>, transform_indices = @transform_7, window_bounds = array<i64: 1, 96>}, {pipeline_mode = #tpu.pipeline_mode<synchronous>, transform_indices = @transform_8, window_bounds = array<i64: 96, 32>}, {pipeline_mode = #tpu.pipeline_mode<synchronous>, transform_indices = @transform_9, window_bounds = array<i64: 1, 32>}, {pipeline_mode = #tpu.pipeline_mode<synchronous>, transform_indices = @transform_10, window_bounds = array<i64: 32, 4>}, {pipeline_mode = #tpu.pipeline_mode<synchronous>, transform_indices = @transform_11, window_bounds = array<i64: 1, 4>}, {transform_indices = @transform_12, window_bounds = array<i64: 8, 4>}]} {
    %c0 = arith.constant 0 : index
    %c0_0 = arith.constant 0 : index
    %0 = vector.load %arg4[%c0, %c0_0] : memref<8x1xi32, #tpu.memory_space<vmem>>, vector<8x1xi32>
    %c1_i32 = arith.constant 1 : i32
    %1 = vector.broadcast %c1_i32 : i32 to vector<8x1xi32>
    %2 = arith.cmpi ne, %0, %1 : vector<8x1xi32>
    %c0_1 = arith.constant 0 : index
    %c0_2 = arith.constant 0 : index
    %3 = vector.load %arg1[%c0_1, %c0_2] : memref<8x32xf32, #tpu.memory_space<vmem>>, vector<8x32xf32>
    %cst = arith.constant 0.000000e+00 : f32
    %4 = vector.shape_cast %2 : vector<8x1xi1> to vector<8x1xi1>
    %5 = vector.broadcast %4 : vector<8x1xi1> to vector<8x32xi1>
    %6 = vector.broadcast %cst : f32 to vector<8x32xf32>
    %7 = arith.select %5, %3, %6 : vector<8x32xi1>, vector<8x32xf32>
    %8 = arith.truncf %7 : vector<8x32xf32> to vector<8x32xbf16>
    %c2_i32 = arith.constant 2 : i32
    %9 = vector.broadcast %c2_i32 : i32 to vector<8x1xi32>
    %10 = arith.cmpi ne, %0, %9 : vector<8x1xi32>
    %c0_3 = arith.constant 0 : index
    %c0_4 = arith.constant 0 : index
    %11 = vector.load %arg2[%c0_3, %c0_4] : memref<8x32xf32, #tpu.memory_space<vmem>>, vector<8x32xf32>
    %cst_5 = arith.constant 0.000000e+00 : f32
    %12 = vector.shape_cast %10 : vector<8x1xi1> to vector<8x1xi1>
    %13 = vector.broadcast %12 : vector<8x1xi1> to vector<8x32xi1>
    %14 = vector.broadcast %cst_5 : f32 to vector<8x32xf32>
    %15 = arith.select %13, %11, %14 : vector<8x32xi1>, vector<8x32xf32>
    %16 = arith.truncf %15 : vector<8x32xf32> to vector<8x32xbf16>
    %c3_i32 = arith.constant 3 : i32
    %17 = vector.broadcast %c3_i32 : i32 to vector<8x1xi32>
    %18 = arith.cmpi ne, %0, %17 : vector<8x1xi32>
    %c0_6 = arith.constant 0 : index
    %c0_7 = arith.constant 0 : index
    %19 = vector.load %arg3[%c0_6, %c0_7] : memref<8x32xf32, #tpu.memory_space<vmem>>, vector<8x32xf32>
    %cst_8 = arith.constant 0.000000e+00 : f32
    %20 = vector.shape_cast %18 : vector<8x1xi1> to vector<8x1xi1>
    %21 = vector.broadcast %20 : vector<8x1xi1> to vector<8x32xi1>
    %22 = vector.broadcast %cst_8 : f32 to vector<8x32xf32>
    %23 = arith.select %21, %19, %22 : vector<8x32xi1>, vector<8x32xf32>
    %24 = arith.truncf %23 : vector<8x32xf32> to vector<8x32xbf16>
    %25 = tpu.concatenate %8, %16, %24 in 1 : vector<8x32xbf16>, vector<8x32xbf16>, vector<8x32xbf16> -> vector<8x96xbf16>
    %c0_9 = arith.constant 0 : index
    %c0_10 = arith.constant 0 : index
    %26 = vector.load %arg5[%c0_9, %c0_10] : memref<96x96xbf16, #tpu.memory_space<vmem>>, vector<96x96xbf16>
    %cst_11 = arith.constant dense<0.000000e+00> : vector<8x96xf32>
    %27 = tpu.matmul %25, %26, %cst_11 {dimension_numbers = #tpu.dot_dimension_numbers<[1], [0], [0], [1], [0, 0, 1, 1], [], []>} : vector<8x96xbf16>, vector<96x96xbf16>, vector<8x96xf32> -> vector<8x96xf32>
    %c0_12 = arith.constant 0 : index
    %c0_13 = arith.constant 0 : index
    %28 = vector.load %arg6[%c0_12, %c0_13] : memref<1x96xf32, #tpu.memory_space<vmem>>, vector<1x96xf32>
    %29 = vector.broadcast %28 : vector<1x96xf32> to vector<8x96xf32>
    %30 = arith.addf %27, %29 : vector<8x96xf32>
    %cst_14 = arith.constant dense<0.000000e+00> : vector<8xf32>
    %31 = vector.multi_reduction <add>, %30, %cst_14 [1] : vector<8x96xf32> to vector<8xf32>
    %32 = vector.shape_cast %31 : vector<8xf32> to vector<8x1xf32>
    %cst_15 = arith.constant 9.600000e+01 : f32
    %33 = vector.broadcast %cst_15 : f32 to vector<8x1xf32>
    %34 = arith.divf %32, %33 : vector<8x1xf32>
    %35 = vector.broadcast %34 : vector<8x1xf32> to vector<8x96xf32>
    %36 = arith.subf %30, %35 : vector<8x96xf32>
    %37 = arith.mulf %36, %36 : vector<8x96xf32>
    %cst_16 = arith.constant dense<0.000000e+00> : vector<8xf32>
    %38 = vector.multi_reduction <add>, %37, %cst_16 [1] : vector<8x96xf32> to vector<8xf32>
    %39 = vector.shape_cast %38 : vector<8xf32> to vector<8x1xf32>
    %cst_17 = arith.constant 9.600000e+01 : f32
    %40 = vector.broadcast %cst_17 : f32 to vector<8x1xf32>
    %41 = arith.divf %39, %40 : vector<8x1xf32>
    %42 = vector.broadcast %34 : vector<8x1xf32> to vector<8x96xf32>
    %43 = arith.subf %30, %42 : vector<8x96xf32>
    %cst_18 = arith.constant 9.99999974E-6 : f32
    %44 = vector.broadcast %cst_18 : f32 to vector<8x1xf32>
    %45 = arith.addf %41, %44 : vector<8x1xf32>
    %46 = math.rsqrt %45 : vector<8x1xf32>
    %47 = vector.broadcast %46 : vector<8x1xf32> to vector<8x96xf32>
    %48 = arith.mulf %43, %47 : vector<8x96xf32>
    %c0_19 = arith.constant 0 : index
    %c0_20 = arith.constant 0 : index
    %49 = vector.load %arg7[%c0_19, %c0_20] : memref<1x96xf32, #tpu.memory_space<vmem>>, vector<1x96xf32>
    %50 = vector.broadcast %49 : vector<1x96xf32> to vector<8x96xf32>
    %51 = arith.mulf %48, %50 : vector<8x96xf32>
    %c0_21 = arith.constant 0 : index
    %c0_22 = arith.constant 0 : index
    %52 = vector.load %arg8[%c0_21, %c0_22] : memref<1x96xf32, #tpu.memory_space<vmem>>, vector<1x96xf32>
    %53 = vector.broadcast %52 : vector<1x96xf32> to vector<8x96xf32>
    %54 = arith.addf %51, %53 : vector<8x96xf32>
    %55 = arith.truncf %54 : vector<8x96xf32> to vector<8x96xbf16>
    %c0_23 = arith.constant 0 : index
    %c0_24 = arith.constant 0 : index
    %56 = vector.load %arg9[%c0_23, %c0_24] : memref<96x32xbf16, #tpu.memory_space<vmem>>, vector<96x32xbf16>
    %cst_25 = arith.constant dense<0.000000e+00> : vector<8x32xf32>
    %57 = tpu.matmul %55, %56, %cst_25 {dimension_numbers = #tpu.dot_dimension_numbers<[1], [0], [0], [1], [0, 0, 1, 1], [], []>} : vector<8x96xbf16>, vector<96x32xbf16>, vector<8x32xf32> -> vector<8x32xf32>
    %c0_26 = arith.constant 0 : index
    %c0_27 = arith.constant 0 : index
    %58 = vector.load %arg10[%c0_26, %c0_27] : memref<1x32xf32, #tpu.memory_space<vmem>>, vector<1x32xf32>
    %59 = vector.broadcast %58 : vector<1x32xf32> to vector<8x32xf32>
    %60 = arith.addf %57, %59 : vector<8x32xf32>
    %cst_28 = arith.constant 0.000000e+00 : f32
    %61 = vector.broadcast %cst_28 : f32 to vector<8x32xf32>
    %62 = arith.maximumf %60, %61 : vector<8x32xf32>
    %63 = arith.truncf %62 : vector<8x32xf32> to vector<8x32xbf16>
    %c0_29 = arith.constant 0 : index
    %c0_30 = arith.constant 0 : index
    %64 = vector.load %arg11[%c0_29, %c0_30] : memref<32x4xbf16, #tpu.memory_space<vmem>>, vector<32x4xbf16>
    %cst_31 = arith.constant dense<0.000000e+00> : vector<8x4xf32>
    %65 = tpu.matmul %63, %64, %cst_31 {dimension_numbers = #tpu.dot_dimension_numbers<[1], [0], [0], [1], [0, 0, 1, 1], [], []>} : vector<8x32xbf16>, vector<32x4xbf16>, vector<8x4xf32> -> vector<8x4xf32>
    %c0_32 = arith.constant 0 : index
    %c0_33 = arith.constant 0 : index
    %66 = vector.load %arg12[%c0_32, %c0_33] : memref<1x4xf32, #tpu.memory_space<vmem>>, vector<1x4xf32>
    %67 = vector.broadcast %66 : vector<1x4xf32> to vector<8x4xf32>
    %68 = arith.addf %65, %67 : vector<8x4xf32>
    %c0_34 = arith.constant 0 : index
    %c0_35 = arith.constant 0 : index
    %69 = vector.load %arg13[%c0_34, %c0_35] : memref<8x4xf32, #tpu.memory_space<vmem>>, vector<8x4xf32>
    tpu.vector_store %arg13[%c0_34, %c0_35], %68 {strides = array<i32>} : memref<8x4xf32, #tpu.memory_space<vmem>>, vector<8x4xf32>,
    return
  }
  func.func @transform_0(%arg0: i32) -> (i32, i32) {
    %c0_i32 = arith.constant 0 : i32
    %c0_i32_0 = arith.constant 0 : i32
    return %arg0, %c0_i32 : i32, i32
  }
  func.func @transform_1(%arg0: i32) -> (i32, i32) {
    %c0_i32 = arith.constant 0 : i32
    %c0_i32_0 = arith.constant 0 : i32
    return %arg0, %c0_i32 : i32, i32
  }
  func.func @transform_2(%arg0: i32) -> (i32, i32) {
    %c0_i32 = arith.constant 0 : i32
    %c0_i32_0 = arith.constant 0 : i32
    return %arg0, %c0_i32 : i32, i32
  }
  func.func @transform_3(%arg0: i32) -> (i32, i32) {
    %c0_i32 = arith.constant 0 : i32
    %c0_i32_0 = arith.constant 0 : i32
    return %arg0, %c0_i32 : i32, i32
  }
  func.func @transform_4(%arg0: i32) -> (i32, i32) {
    %c0_i32 = arith.constant 0 : i32
    %c0_i32_0 = arith.constant 0 : i32
    %c0_i32_1 = arith.constant 0 : i32
    return %c0_i32, %c0_i32_0 : i32, i32
  }
  func.func @transform_5(%arg0: i32) -> (i32, i32) {
    %c0_i32 = arith.constant 0 : i32
    %c0_i32_0 = arith.constant 0 : i32
    %c0_i32_1 = arith.constant 0 : i32
    return %c0_i32, %c0_i32_0 : i32, i32
  }
  func.func @transform_6(%arg0: i32) -> (i32, i32) {
    %c0_i32 = arith.constant 0 : i32
    %c0_i32_0 = arith.constant 0 : i32
    %c0_i32_1 = arith.constant 0 : i32
    return %c0_i32, %c0_i32_0 : i32, i32
  }
  func.func @transform_7(%arg0: i32) -> (i32, i32) {
    %c0_i32 = arith.constant 0 : i32
    %c0_i32_0 = arith.constant 0 : i32
    %c0_i32_1 = arith.constant 0 : i32
    return %c0_i32, %c0_i32_0 : i32, i32
  }
  func.func @transform_8(%arg0: i32) -> (i32, i32) {
    %c0_i32 = arith.constant 0 : i32
    %c0_i32_0 = arith.constant 0 : i32
    %c0_i32_1 = arith.constant 0 : i32
    return %c0_i32, %c0_i32_0 : i32, i32
  }
  func.func @transform_9(%arg0: i32) -> (i32, i32) {
    %c0_i32 = arith.constant 0 : i32
    %c0_i32_0 = arith.constant 0 : i32
    %c0_i32_1 = arith.constant 0 : i32
    return %c0_i32, %c0_i32_0 : i32, i32
  }
  func.func @transform_10(%arg0: i32) -> (i32, i32) {
    %c0_i32 = arith.constant 0 : i32
    %c0_i32_0 = arith.constant 0 : i32
    %c0_i32_1 = arith.constant 0 : i32
    return %c0_i32, %c0_i32_0 : i32, i32
  }
  func.func @transform_11(%arg0: i32) -> (i32, i32) {
    %c0_i32 = arith.constant 0 : i32
    %c0_i32_0 = arith.constant 0 : i32
    %c0_i32_1 = arith.constant 0 : i32
    return %c0_i32, %c0_i32_0 : i32, i32
  }
  func.func @transform_12(%arg0: i32) -> (i32, i32) {
    %c0_i32 = arith.constant 0 : i32
    %c0_i32_0 = arith.constant 0 : i32
    return %arg0, %c0_i32 : i32, i32
  }
}

</mosaic_0001>

<bundles_post_ra>
// kernel: modal_concat_zero_padding_forward.1
= control target key start
LH: loop header
LB: loop body
LE: loop exit
PB: predicated region body
PF: predicated region fallthrough
CT: control target
= control target key end

     0   :  { %v486_v0 = vmov 0   ;;  %v487_v5 = vmov 0.0   ;;  %vm488_vm3 = vmmov 0   ;;  %s489_s19 = smov 32   ;;  %s490_s20 = smov 64   ;;  %vm76_vm7 = vcmask 261120   ;;  %s654_s3 = inlined_call_operand.vmem [shape: s32[8,1], index: 3, kind: input, shape index: {}]   ;;  %s655_s4 = inlined_call_operand.vmem [shape: bf16[96,96], index: 4, kind: input, shape index: {}]   ;;  %s656_s1 = inlined_call_operand.vmem [shape: f32[8,32], index: 1, kind: input, shape index: {}]   ;;  %s657_s2 = inlined_call_operand.vmem [shape: f32[8,32], index: 2, kind: input, shape index: {}]   ;;  %s658_s0 = inlined_call_operand.vmem [shape: f32[8,32], index: 0, kind: input, shape index: {}]   ;;  %s659_s5 = inlined_call_operand.vmem [shape: f32[1,96], index: 5, kind: input, shape index: {}]   ;;  %s660_s8 = inlined_call_operand.vmem [shape: bf16[96,32], index: 8, kind: input, shape index: {}]   ;;  %s661_s10 = inlined_call_operand.vmem [shape: bf16[32,4], index: 10, kind: input, shape index: {}]   ;;  %s662_s6 = inlined_call_operand.vmem [shape: f32[1,96], index: 6, kind: input, shape index: {}]   ;;  %s663_s7 = inlined_call_operand.vmem [shape: f32[1,96], index: 7, kind: input, shape index: {}]   ;;  %s664_s9 = inlined_call_operand.vmem [shape: f32[1,32], index: 9, kind: input, shape index: {}]   ;;  %s665_s11 = inlined_call_operand.vmem [shape: f32[1,4], index: 11, kind: input, shape index: {}]   ;;  %s666_s12 = inlined_call_operand.vmem [shape: f32[8,4], index: 12, kind: output, shape index: {}]  }
   0x1   :  { %468 = vset.pattern.permute.xlu0 %v486_v0  ;;  %v42_v1 = vld [vmem:[%s654_s3] sm:$0xff]  ;;  %469 = vset.pattern.permute.xlu1 %v486_v0  ;;  %v471_v7 = vld [vmem:[%s655_s4 + $0x8] sm:$0xff]   ;;  %v472_v8 = vld [vmem:[%s655_s4 + $0x10] sm:$0xff]   ;;  %vm80_vm8 = vcmask 523264   ;;  %vm138_vm9 = vcmask 785408   ;;  %vm378_vm10 = vcmask 31744  }
   0x2   :  { %vm52_vm0 = vcmp.ne.s32.totalorder %v42_v1, 2  ;;  %vm61_vm1 = vcmp.ne.s32.totalorder %v42_v1, 3  ;;  %vm43_vm2 = vcmp.ne.s32.totalorder %v42_v1, 1  ;;  %423 = vmatprep.subr.bf16.mxu0 %v487_v5  ;;  %v470_v6 = vld [vmem:[%s655_s4] sm:$0xff]   ;;  %439 = vmatprep.subr.bf16.mxu1 %v487_v5  ;;  %v473_v9 = vld [vmem:[%s655_s4 + $0x18] sm:$0xff]   ;;  %v475_v11 = vld [vmem:[%s655_s4 + $0x28] sm:$0xff]  }
   0x3   :  { %v54_v2 = vsel %vm52_vm0, 1, %v486_v0  ;;  %v45_v3 = vsel %vm43_vm2, 1, %v486_v0  ;;  %v63_v4 = vsel %vm61_vm1, 1, %v486_v0  ;;  %424 = vmatpush3.bf16.msra.mxu0 %v470_v6  ;;  %v474_v10 = vld [vmem:[%s655_s4 + $0x20] sm:$0xff]   ;;  %435 = vmatprep.mubr.msk.bf16.mxu0 %vm488_vm3, %v487_v5  ;;  %v477_v41 = vld [vmem:[%s660_s8 + $0x8] sm:$0xff]   ;;  %v478_v42 = vld [vmem:[%s660_s8 + $0x10] sm:$0xff]  }
   0x4   :  { %56 = vperm.xlu0 %468, %v54_v2   ;;  %47 = vperm.xlu1 %469, %v45_v3   ;;  %v53_v12 = vld [vmem:[%s656_s1] sm:$0xff]  ;;  %v479_v43 = vld [vmem:[%s660_s8 + $0x18] sm:$0xff]   ;;  %v481_v45 = vld [vmem:[%s660_s8 + $0x28] sm:$0xff]  }
   0x5   :  { %425 = vmatprep.subr.bf16.mxu0 %v487_v5  ;;  %451 = vmatprep.mubr.msk.bf16.mxu1 %vm488_vm3, %v487_v5  ;;  %v62_v16 = vld [vmem:[%s657_s2] sm:$0xff]  ;;  %v483_v57 = vld [vmem:[%s661_s10 + $0x8] sm:$0xff]  }
   0x6   :  { %v44_v21 = vld [vmem:[%s658_s0] sm:$0xff] }
   0x7   :  { %426 = vmatpush3.bf16.msra.mxu0 %v471_v7  ;;  %v384_v28 = vld [vmem:[%s659_s5] ss:$0 sm:$0xff] }
   0x8   :  { %65 = vperm.xlu0 %468, %v63_v4   ;;  %427 = vmatprep.subr.bf16.mxu0 %v487_v5  ;;  %v476_v40 = vld [vmem:[%s660_s8] sm:$0xff]  }
   0x9   :  { %440 = vmatpush3.bf16.msra.mxu1 %v476_v40  ;;  %v480_v44 = vld [vmem:[%s660_s8 + $0x20] sm:$0xff]  }
   0xa   :  { %441 = vmatprep.subr.bf16.mxu1 %v487_v5  ;;  %v482_v46 = vld [vmem:[%s661_s10] sm:$0xff]  }
   0xb   :  { %428 = vmatpush3.bf16.msra.mxu0 %v472_v8  ;;  %v392_v51 = vld [vmem:[%s662_s6] ss:$0 sm:$0xff] }
   0xc   :  { %429 = vmatprep.subr.bf16.mxu0 %v487_v5  ;;  %v393_v53 = vld [vmem:[%s663_s7] ss:$0 sm:$0xff] }
   0xd   :  { %442 = vmatpush3.bf16.msra.mxu1 %v477_v41  ;;  %v394_v58 = vld [vmem:[%s664_s9] ss:$0 sm:$0xff] }
   0xe   :  { %443 = vmatprep.subr.bf16.mxu1 %v487_v5  ;;  %v402_v2 = vld [vmem:[%s665_s11] ss:$0 sm:$0xff] }
   0xf   :  { %430 = vmatpush3.bf16.msra.mxu0 %v473_v9 }
  0x10   :  { %431 = vmatprep.subr.bf16.mxu0 %v487_v5 }
  0x11   :  { %444 = vmatpush3.bf16.msra.mxu1 %v478_v42 }
  0x12   :  { %445 = vmatprep.subr.bf16.mxu1 %v487_v5 }
  0x13   :  { %432 = vmatpush3.bf16.msra.mxu0 %v474_v10 }
  0x14   :  { %433 = vmatprep.subr.bf16.mxu0 %v487_v5 }
  0x15   :  { %446 = vmatpush3.bf16.msra.mxu1 %v479_v43 }
  0x16   :  { %447 = vmatprep.subr.bf16.mxu1 %v487_v5 }
  0x17   :  { %434 = vmatpush3.bf16.msra.mxu0 %v475_v11 }
  0x18   :  { %455 = vmatprep.subr.bf16.mxu0 %v487_v5 }
  0x19   :  { %448 = vmatpush3.bf16.msra.mxu1 %v480_v44 }
  0x1a   :  { %449 = vmatprep.subr.bf16.mxu1 %v487_v5 }
  0x1d   :  { %450 = vmatpush3.bf16.msra.mxu1 %v481_v45 }
  0x83   :  { %v57_v13 = vpop.permute.xlu0 %56  ;;  %v48_v20 = vpop.permute.xlu1 %47 }
  0x84   :  { %vm58_vm4 = vcmp.eq.s32.totalorder %v57_v13, 1  ;;  %vm49_vm6 = vcmp.eq.s32.totalorder %v48_v20, 1 }
  0x85   :  { %v59_v14 = vsel %vm58_vm4, %v53_v12, 0.0  ;;  %v50_v22 = vsel %vm49_vm6, %v44_v21, 0.0 }
  0x86   :  { %v60_v15 = vpack.c.bf16 %v59_v14, %v59_v14  ;;  %v51_v23 = vpack.c.bf16 %v50_v22, %v50_v22 }
  0x87   :  { %v66_v17 = vpop.permute.xlu0 %65 }
  0x88   :  { %vm67_vm5 = vcmp.eq.s32.totalorder %v66_v17, 1  ;;  %71 = vrot.lane.b32.xlu1 %v60_v15, %s489_s19 }
  0x89   :  { %v68_v18 = vsel %vm67_vm5, %v62_v16, 0.0 }
  0x8a   :  { %v69_v19 = vpack.c.bf16 %v68_v18, %v68_v18 }
  0x8c   :  { %74 = vrot.lane.b32.xlu0 %v69_v19, %s490_s20 }
  0xfa   :  { %v72_v24 = vpop.permute.xlu1 %71 }
  0xfb   :  { %v79_v25 = vsel %vm76_vm7, %v51_v23, %v72_v24 }
  0xfe   :  { %v75_v26 = vpop.permute.xlu0 %74 }
  0xff   :  { %v82_v27 = vsel %vm80_vm8, %v79_v25, %v75_v26 }
 0x100   :  { %436 = vmatmul.mubr.msk.bf16.vlgmr.msra.gmra.mrb[0].mxu0 %vm138_vm9, %v82_v27 }
 0x101   :  { %459 = vmatprep.mubr.msk.bf16.mxu0 %vm488_vm3, %v487_v5  ;;  %456 = vmatpush3.bf16.msra.mxu0 %v482_v46 }
 0x102   :  { %457 = vmatprep.subr.bf16.mxu0 %v487_v5 }
 0x105   :  { %458 = vmatpush3.bf16.msra.mxu0 %v483_v57 }
 0x1d3   :  { %v175_v29 = vpop.f32.mrb[0].mxu0 }
 0x1d4   :  { %v176_v30 = vadd.f32 %v384_v28, %v175_v29  ;;  %v437_v31 = vpop.f32.mrb[1].mxu0 }
 0x1d5   :  { %v178_v32 = vpop.f32.mrb[2].mxu0 }
 0x1d6   :  { %v438_v33 = vpop.f32.mrb[3].mxu0  ;;  %v181_v34 = vsel %vm138_vm9, %v176_v30, 0.0 }
 0x1d7   :  { %182 = vadd.xlane.f32.xlu1 %v181_v34 }
 0x264   :  { %v183_v35 = vpop.xlane.xlu1 %182 }
 0x265   :  { %v185_v36 = vmul.f32 0.010416667, %v183_v35 }
 0x267   :  { %v186_v37 = vsub.f32 %v176_v30, %v185_v36 }
 0x269   :  { %v187_v38 = vmul.f32 %v186_v37, %v186_v37 }
 0x26b   :  { %v188_v39 = vsel %vm138_vm9, %v187_v38, 0.0 }
 0x26c   :  { %189 = vadd.xlane.f32.xlu0 %v188_v39 }
 0x2f9   :  { %v190_v47 = vpop.xlane.xlu0 %189 }
 0x2fa   :  { %v191_v48 = vmul.f32 0.010416667, %v190_v47 }
 0x2fc   :  { %v192_v49 = vadd.f32 1e-05, %v191_v48 }
 0x2fe   :  { %484 = vrsqrt.f32 %v192_v49 }
 0x308   :  { %v485_v50 = vpop.eup %484 }
 0x309   :  { %v194_v52 = vmul.f32 %v485_v50, %v186_v37 }
 0x30b   :  { %v202_v54 = vmul.f32 %v392_v51, %v194_v52 }
 0x30d   :  { %v210_v55 = vadd.f32 %v393_v53, %v202_v54 }
 0x30f   :  { %v211_v56 = vpack.c.bf16 %v210_v55, %v210_v55 }
 0x311   :  { %452 = vmatmul.mubr.msk.bf16.vlgmr.msra.gmra.mrb[0].mxu1 %vm138_vm9, %v211_v56 }
 0x3e4   :  { %v304_v59 = vpop.f32.mrb[0].mxu1 }
 0x3e5   :  { %v305_v60 = vadd.f32 %v394_v58, %v304_v59  ;;  %v453_v61 = vpop.f32.mrb[1].mxu1 }
 0x3e6   :  { %v307_v62 = vpop.f32.mrb[2].mxu1 }
 0x3e7   :  { %v310_v63 = vmax.f32 %v305_v60, 0.0  ;;  %v454_v0 = vpop.f32.mrb[3].mxu1 }
 0x3e9   :  { %v311_v1 = vpack.c.bf16 %v310_v63, %v310_v63 }
 0x3eb   :  { %460 = vmatmul.mubr.msk.bf16.vlgmr.msra.gmra.mrb[4].mxu0 %vm76_vm7, %v311_v1 }
 0x4be   :  { %v372_v3 = vpop.f32.mrb[4].mxu0 }
 0x4bf   :  { %v373_v4 = vadd.f32 %v402_v2, %v372_v3  ;;  %v461_v5 = vpop.f32.mrb[5].mxu0 }
 0x4c0   :  { %v375_v6 = vpop.f32.mrb[6].mxu0 }
 0x4c1   :  { %379 = vst.msk [vmem:[%s666_s12] sm:$0xff] %vm378_vm10, %v373_v4  ;;  %v462_v7 = vpop.f32.mrb[7].mxu0 }

</bundles_post_ra>
